<compile_context>
chip_gen: v5e
topology: v5e:2x2
jax: 0.10.0
libtpu: 0.0.40
codegen_flags: <defaults>
</compile_context>

<pallas_src>
import jax
import jax.numpy as jnp
from jax import lax
from jax.experimental import pallas as pl
from jax.experimental.pallas import tpu as pltpu

LANE = 128
SUBLANES = 8
TILE_QUANTUM = SUBLANES * LANE          # 1024: minimal sublane-aligned batch quantum
MAX_TILE_B = 32768                      # batch elements per grid step (sweep 16K-64K)
HIDDEN = 64
SMALL_BATCH_FALLBACK = 512              # below this, plain fused XLA beats a pallas_call


def _round_up(x, m):
    return ((x + m - 1) // m) * m


def actor_kernel(x_ref, w1_ref, b1_ref, w2_ref, b2_ref, out_ref):
    # x_ref : (3, TSB, 128) f32 in VMEM   -- batch dense on sublanes+lanes
    # w1_ref: (3, 64), b1_ref: (64,), w2_ref: (64,), b2_ref: (1,)  -- SMEM scalars
    # out_ref: (TSB, 128) f32
    x0 = x_ref[0]
    x1 = x_ref[1]
    x2 = x_ref[2]
    hidden = w1_ref.shape[1]

    def body(j, y):
        # fused layer1 -> relu -> layer2 contribution of hidden unit j (VPU only)
        pre = (w1_ref[0, j] * x0 + w1_ref[1, j] * x1 + w1_ref[2, j] * x2
               + b1_ref[j])
        return y + w2_ref[j] * jnp.maximum(pre, 0.0)

    y = lax.fori_loop(0, hidden, body, jnp.zeros(out_ref.shape, jnp.float32))
    out_ref[...] = 2.0 * jnp.tanh(y + b2_ref[0])     # tanh runs on the EUP slot


def _actor_reference(state, w1, b1, w2, b2):
    """Pure-JAX fused expression (also the small-batch fast path)."""
    s = state.astype(jnp.float32)
    h = jnp.maximum(s @ jnp.asarray(w1, jnp.float32).reshape(3, HIDDEN)
                    + jnp.asarray(b1, jnp.float32).reshape(1, HIDDEN), 0.0)
    y = h @ jnp.asarray(w2, jnp.float32).reshape(HIDDEN, 1) \
        + jnp.asarray(b2, jnp.float32).reshape(1, 1)
    return 2.0 * jnp.tanh(y)


def actor_forward(state, w1, b1, w2, b2, use_pallas=None):
    """state: (B, 3); w1: (3, 64); b1: (64,); w2: (64, 1)/(64,); b2: (1,)."""
    B = state.shape[0]
    if use_pallas is None:
        use_pallas = B >= SMALL_BATCH_FALLBACK
    if not use_pallas:
        return _actor_reference(state, w1, b1, w2, b2)

    # ---- batch tiling: lane-aligned, sublane-quantized, >=2 steps when possible
    bp = _round_up(B, LANE)
    if bp <= TILE_QUANTUM:
        tb = bp                                           # single tile == full dims
    else:
        n_q = pl.cdiv(bp, TILE_QUANTUM)                   # 1024-elem quanta needed
        n_tiles = max(2, pl.cdiv(n_q, MAX_TILE_B // TILE_QUANTUM))
        tq = pl.cdiv(n_q, n_tiles)
        tb = tq * TILE_QUANTUM
        bp = n_tiles * tb
    grid = bp // tb
    tsb = tb // LANE                                      # sublanes per tile
    sb_total = bp // LANE

    # ---- host-side layout plumbing (pad, not zeros+scatter)
    # TODO(synk): if the upstream producer can emit state feature-major (3, B),
    # take it directly and drop this transpose pass.
    xT = jnp.pad(state.astype(jnp.float32).T, ((0, 0), (0, bp - B)))   # (3, bp)
    x3d = xT.reshape(3, sb_total, LANE)                                # free reshape

    w1s = jnp.asarray(w1, jnp.float32).reshape(3, HIDDEN)
    b1s = jnp.asarray(b1, jnp.float32).reshape(HIDDEN)
    w2s = jnp.asarray(w2, jnp.float32).reshape(HIDDEN)
    b2s = jnp.asarray(b2, jnp.float32).reshape(1)

    out2d = pl.pallas_call(
        actor_kernel,
        out_shape=jax.ShapeDtypeStruct((sb_total, LANE), jnp.float32),
        grid_spec=pl.GridSpec(
            grid=(grid,),
            in_specs=[
                pl.BlockSpec((3, tsb, LANE), lambda i: (0, i, 0)),        # state tile
                pl.BlockSpec(memory_space=pltpu.MemorySpace.SMEM),        # w1 (3,64)
                pl.BlockSpec(memory_space=pltpu.MemorySpace.SMEM),        # b1 (64,)
                pl.BlockSpec(memory_space=pltpu.MemorySpace.SMEM),        # w2 (64,)
                pl.BlockSpec(memory_space=pltpu.MemorySpace.SMEM),        # b2 (1,)
            ],
            out_specs=pl.BlockSpec((tsb, LANE), lambda i: (i, 0)),
        ),
        compiler_params=pltpu.CompilerParams(
            dimension_semantics=("parallel",)),           # shards batch across TCs
    )(x3d, w1s, b1s, w2s, b2s)

    return out2d.reshape(bp)[:B].reshape(B, 1)


def init_params(key):
    # Deterministic init mimicking PyTorch nn.Linear default:
    # U(-1/sqrt(fan_in), 1/sqrt(fan_in)) for both weight and bias.
    k1, k2, k3, k4 = jax.random.split(key, 4)
    bnd1 = 1.0 / jnp.sqrt(3.0)
    bnd2 = 1.0 / jnp.sqrt(64.0)
    w1 = jax.random.uniform(k1, (3, HIDDEN), jnp.float32, -bnd1, bnd1)
    b1 = jax.random.uniform(k2, (HIDDEN,), jnp.float32, -bnd1, bnd1)
    w2 = jax.random.uniform(k3, (HIDDEN, 1), jnp.float32, -bnd2, bnd2)
    b2 = jax.random.uniform(k4, (1,), jnp.float32, -bnd2, bnd2)
    return w1, b1, w2, b2


if __name__ == "__main__":
    key = jax.random.PRNGKey(0)
    pkey, skey1, skey2 = jax.random.split(key, 3)
    w1, b1, w2, b2 = init_params(pkey)

    # Small-batch check: force the Pallas path (single (1,128) tile).
    B1 = 8
    state1 = jax.random.normal(skey1, (B1, 3), jnp.float32)
    out1 = jax.block_until_ready(actor_forward(state1, w1, b1, w2, b2, use_pallas=True))
    ref1 = _actor_reference(state1, w1, b1, w2, b2)
    assert out1.shape == (B1, 1)
    assert jnp.allclose(out1, ref1, atol=1e-5, rtol=1e-5)

    # Multi-tile + padding check: 1500 -> padded 2048, grid of 2 parallel steps.
    B2 = 1500
    state2 = jax.random.normal(skey2, (B2, 3), jnp.float32)
    out2 = jax.block_until_ready(actor_forward(state2, w1, b1, w2, b2))
    ref2 = _actor_reference(state2, w1, b1, w2, b2)
    assert out2.shape == (B2, 1)
    assert jnp.allclose(out2, ref2, atol=1e-5, rtol=1e-5)

    print("KERNEL_OK")
</pallas_src>

<mosaic_0001>
module attributes {stable_mosaic.version = 11 : i64} {
  func.func @actor_kernel(%arg0: i32, %arg1: memref<3x1x128xf32, #tpu.memory_space<vmem>>, %arg2: memref<3x64xf32, #tpu.memory_space<smem>>, %arg3: memref<64xf32, #tpu.memory_space<smem>>, %arg4: memref<64xf32, #tpu.memory_space<smem>>, %arg5: memref<1xf32, #tpu.memory_space<smem>>, %arg6: memref<1x128xf32, #tpu.memory_space<vmem>>) attributes {dimension_semantics = [#tpu.dimension_semantics<parallel>], iteration_bounds = array<i64: 1>, scalar_prefetch = 0 : i64, scratch_operands = 0 : i64, tpu.core_type = #tpu.core_type<tc>, window_params = [{transform_indices = @transform_0, window_bounds = array<i64: 3, 1, 128>}, {transform_indices = @transform_1, window_bounds = array<i64: 3, 64>}, {transform_indices = @transform_2, window_bounds = array<i64: 64>}, {transform_indices = @transform_3, window_bounds = array<i64: 64>}, {transform_indices = @transform_4, window_bounds = array<i64: 1>}, {transform_indices = @transform_5, window_bounds = array<i64: 1, 128>}]} {
    %c0 = arith.constant 0 : index
    %c0_0 = arith.constant 0 : index
    %c0_1 = arith.constant 0 : index
    %0 = vector.load %arg1[%c0, %c0_0, %c0_1] : memref<3x1x128xf32, #tpu.memory_space<vmem>>, vector<1x1x128xf32>
    %1 = vector.shape_cast %0 : vector<1x1x128xf32> to vector<1x128xf32>
    %c1 = arith.constant 1 : index
    %c0_2 = arith.constant 0 : index
    %c0_3 = arith.constant 0 : index
    %2 = vector.load %arg1[%c1, %c0_2, %c0_3] : memref<3x1x128xf32, #tpu.memory_space<vmem>>, vector<1x1x128xf32>
    %3 = vector.shape_cast %2 : vector<1x1x128xf32> to vector<1x128xf32>
    %c2 = arith.constant 2 : index
    %c0_4 = arith.constant 0 : index
    %c0_5 = arith.constant 0 : index
    %4 = vector.load %arg1[%c2, %c0_4, %c0_5] : memref<3x1x128xf32, #tpu.memory_space<vmem>>, vector<1x1x128xf32>
    %5 = vector.shape_cast %4 : vector<1x1x128xf32> to vector<1x128xf32>
    %cst = arith.constant 0.000000e+00 : f32
    %6 = vector.broadcast %cst : f32 to vector<1x128xf32>
    %c0_i32 = arith.constant 0 : i32
    %c64_i32 = arith.constant 64 : i32
    %7 = arith.addi %c0_i32, %c64_i32 : i32
    %c1_i32 = arith.constant 1 : i32
    %8 = scf.for %arg7 = %c0_i32 to %7 step %c1_i32 iter_args(%arg8 = %6) -> (vector<1x128xf32>)  : i32 {
      %c0_11 = arith.constant 0 : index
      %16 = arith.index_cast %arg7 : i32 to index
      %17 = memref.load %arg2[%c0_11, %16] : memref<3x64xf32, #tpu.memory_space<smem>>
      %18 = vector.broadcast %17 : f32 to vector<1x128xf32>
      %19 = arith.mulf %18, %1 : vector<1x128xf32>
      %c1_12 = arith.constant 1 : index
      %20 = arith.index_cast %arg7 : i32 to index
      %21 = memref.load %arg2[%c1_12, %20] : memref<3x64xf32, #tpu.memory_space<smem>>
      %22 = vector.broadcast %21 : f32 to vector<1x128xf32>
      %23 = arith.mulf %22, %3 : vector<1x128xf32>
      %24 = arith.addf %19, %23 : vector<1x128xf32>
      %c2_13 = arith.constant 2 : index
      %25 = arith.index_cast %arg7 : i32 to index
      %26 = memref.load %arg2[%c2_13, %25] : memref<3x64xf32, #tpu.memory_space<smem>>
      %27 = vector.broadcast %26 : f32 to vector<1x128xf32>
      %28 = arith.mulf %27, %5 : vector<1x128xf32>
      %29 = arith.addf %24, %28 : vector<1x128xf32>
      %30 = arith.index_cast %arg7 : i32 to index
      %31 = memref.load %arg3[%30] : memref<64xf32, #tpu.memory_space<smem>>
      %32 = vector.broadcast %31 : f32 to vector<1x128xf32>
      %33 = arith.addf %29, %32 : vector<1x128xf32>
      %34 = arith.index_cast %arg7 : i32 to index
      %35 = memref.load %arg4[%34] : memref<64xf32, #tpu.memory_space<smem>>
      %cst_14 = arith.constant 0.000000e+00 : f32
      %36 = vector.broadcast %cst_14 : f32 to vector<1x128xf32>
      %37 = arith.maximumf %33, %36 : vector<1x128xf32>
      %38 = vector.broadcast %35 : f32 to vector<1x128xf32>
      %39 = arith.mulf %38, %37 : vector<1x128xf32>
      %40 = arith.addf %arg8, %39 : vector<1x128xf32>
      scf.yield %40 : vector<1x128xf32>
    }
    %c64_i32_6 = arith.constant 64 : i32
    %c0_7 = arith.constant 0 : index
    %9 = memref.load %arg5[%c0_7] : memref<1xf32, #tpu.memory_space<smem>>
    %10 = vector.broadcast %9 : f32 to vector<1x128xf32>
    %11 = arith.addf %8, %10 : vector<1x128xf32>
    %12 = math.tanh %11 : vector<1x128xf32>
    %cst_8 = arith.constant 2.000000e+00 : f32
    %13 = vector.broadcast %cst_8 : f32 to vector<1x128xf32>
    %14 = arith.mulf %13, %12 : vector<1x128xf32>
    %c0_9 = arith.constant 0 : index
    %c0_10 = arith.constant 0 : index
    %15 = vector.load %arg6[%c0_9, %c0_10] : memref<1x128xf32, #tpu.memory_space<vmem>>, vector<1x128xf32>
    tpu.vector_store %arg6[%c0_9, %c0_10], %14 {strides = array<i32>} : memref<1x128xf32, #tpu.memory_space<vmem>>, vector<1x128xf32>,
    return
  }
  func.func @transform_0(%arg0: i32) -> (i32, i32, i32) {
    %c0_i32 = arith.constant 0 : i32
    %c0_i32_0 = arith.constant 0 : i32
    %c0_i32_1 = arith.constant 0 : i32
    return %c0_i32, %arg0, %c0_i32_0 : i32, i32, i32
  }
  func.func @transform_1(%arg0: i32) -> (i32, i32) {
    %c0_i32 = arith.constant 0 : i32
    %c0_i32_0 = arith.constant 0 : i32
    %c0_i32_1 = arith.constant 0 : i32
    return %c0_i32, %c0_i32_0 : i32, i32
  }
  func.func @transform_2(%arg0: i32) -> i32 {
    %c0_i32 = arith.constant 0 : i32
    %c0_i32_0 = arith.constant 0 : i32
    return %c0_i32 : i32
  }
  func.func @transform_3(%arg0: i32) -> i32 {
    %c0_i32 = arith.constant 0 : i32
    %c0_i32_0 = arith.constant 0 : i32
    return %c0_i32 : i32
  }
  func.func @transform_4(%arg0: i32) -> i32 {
    %c0_i32 = arith.constant 0 : i32
    %c0_i32_0 = arith.constant 0 : i32
    return %c0_i32 : i32
  }
  func.func @transform_5(%arg0: i32) -> (i32, i32) {
    %c0_i32 = arith.constant 0 : i32
    %c0_i32_0 = arith.constant 0 : i32
    return %arg0, %c0_i32 : i32, i32
  }
}

</mosaic_0001>

<bundles_post_ra>
// kernel: tpu_custom_call.1
= control target key start
LH: loop header
LB: loop body
LE: loop exit
PB: predicated region body
PF: predicated region fallthrough
CT: control target
= control target key end

     0   :  { %s359_s0 = inlined_call_operand.hbm [shape: f32[3,1,128], index: 0, kind: input, shape index: {}]   ;;  %s360_s1 = inlined_call_operand.hbm [shape: f32[3,64], index: 1, kind: input, shape index: {}]   ;;  %s361_s2 = inlined_call_operand.vmem [shape: f32[64], index: 2, kind: input, shape index: {}]   ;;  %s362_s3 = inlined_call_operand.vmem [shape: f32[64], index: 3, kind: input, shape index: {}]   ;;  %s363_s4 = inlined_call_operand.<no memory space> [shape: f32[1], index: 4, kind: input, shape index: {}]   ;;  %s364_s5 = inlined_call_operand.hbm [shape: f32[1,128], index: 5, kind: output, shape index: {}]  }
   0x1   :  { %10 = sst [smem:[#allocation2]] %s363_s4 }
   0x2   :  { %11 = vsyncpa [#allocation4], 0 }
   0x3   :  { %12 = vsyncpa [#allocation6], 0 }
   0x4   :  { %13 = vsyncpa [#allocation7], 0 }
   0x5   :  { %14 = vsyncpa [#allocation11], 0 }
   0x6   :  { %15 = vsyncpa [#allocation5], 0  ;;  %s20_s22 = sshll.u32 %s359_s0, 4  ;;  %s291_s23 = smov [#allocation3]   ;;  %s21_s22 = int_to_ptr.hbm [resolvable:$true] %s20_s22 }
   0x7   :  { %s22_s24 = sshll.u32 %s291_s23, 4  ;;  %s34_s27 = sshll.u32 %s360_s1, 4  ;;  %s23_s24 = int_to_ptr.vmem [resolvable:$true] %s22_s24  ;;  %s35_s27 = int_to_ptr.hbm [resolvable:$true] %s34_s27 }
   0x8   :  { %s292_s28 = smov 16   ;;  %s293_s29 = smov 1  }
   0x9   :  { %28 = dma.hbm_to_vmem [thread:$0]  %s21_s22, 48, %s23_s24, [#allocation4], %s292_s28, %s292_s28, %s293_s29  }
   0xa   :  { %s294_s4 = smov [#allocation8]   ;;  %s43_s7 = sshll.u32 %s361_s2, 4  ;;  %s44_s7 = int_to_ptr.vmem [resolvable:$true] %s43_s7 }
   0xb   :  { %37 = dma.hbm_to_smem %s35_s27, 64, %s294_s4, [#allocation6]  }
   0xc   :  { %s52_s9 = sshll.u32 %s362_s3, 4  ;;  %s295_s10 = smov [#allocation9]   ;;  %s53_s9 = int_to_ptr.vmem [resolvable:$true] %s52_s9 }
   0xd   :  { %46 = dma.vmem_to_smem %s44_s7, 16, %s295_s10, [#allocation7]  }
   0xe   :  { %s296_s11 = smov [#allocation10]  }
   0xf   :  { %55 = dma.vmem_to_smem %s53_s9, 16, %s296_s11, [#allocation11]  }
  0x10   :  { %273 = dma.done.wait [#allocation4], 48  }
  0x11   :  { %274 = vsyncadd [#allocation4], 4294967248 }
  0x12   :  { %275 = dma.done.wait [#allocation6], 64  }
  0x13   :  { %276 = vsyncadd [#allocation6], 4294967232 }
  0x14   :  { %277 = dma.done.wait [#allocation7], 16  }
  0x15   :  { %278 = vsyncadd [#allocation7], 4294967280 }
  0x16   :  { %279 = dma.done.wait [#allocation11], 16  }
  0x17   :  { %280 = vsyncadd [#allocation11], 4294967280 }
  0x18   :  { %74 = sfence }
  0x19   :  { %v75_v0 = vld [vmem:[#allocation3] sm:$0x1]  ;;  %v77_v1 = vld [vmem:[#allocation3 + $0x1] sm:$0x1]  ;;  %v79_v2 = vld [vmem:[#allocation3 + $0x2] sm:$0x1] }
  0x1a   :  { %v283_v3 = vmov 0.0   ;;  %s343_s1 = smov 0  }
  0x1b LB: > { %s87_s2 = sld [smem:[#allocation8 + %s289_s1]]  ;;  %s90_s3 = sshra.s32 %s289_s1, 7  ;;  %s289_s1 = sphi %s343_s1, %s85_s1   ;;  %v285_v3 = vphi %v283_v3, %v284_v3  }
  0x1c   : > { %s152_s12 = sshll.u32 %s90_s3, 7  ;;  %s95_s13 = sand.u32 127, %s289_s1 }
  0x1d   : > { %s153_s14 = sadd.s32 128, %s152_s12  ;;  %s155_s15 = sadd.s32 256, %s152_s12 }
  0x1e   : > { %s96_s16 = sadd.s32 %s153_s14, %s95_s13  ;;  %s103_s17 = sadd.s32 %s155_s15, %s95_s13 }
  0x1f   : > { %s97_s18 = sld [smem:[#allocation8 + %s96_s16]] }
  0x20   : > { %s104_s19 = sld [smem:[#allocation8 + %s103_s17]] }
  0x21   : > { %v88_v4 = vstv %s87_s2  ;;  %s108_s20 = sld [smem:[#allocation9 + %s289_s1]] }
  0x22   : > { %v89_v5 = vmul.f32 %v88_v4, %v75_v0  ;;  %s111_s21 = sld [smem:[#allocation10 + %s289_s1]]  ;;  %s85_s1 = sadd.s32 1, %s289_s1  }
  0x23   : > { %p82_p0 = scmp.ge.s32.totalorder %s85_s1, 64  }
  0x24   :  { %s116_s22 = sld [smem:[#allocation2]] (%p82_p0)  ;;  %s297_s23 = smov (%p82_p0), [#allocation12]  }
  0x25   : > { %v98_v6 = vstv %s97_s18  ;;  %s127_s24 = sshll.u32 (%p82_p0), %s297_s23, 4  ;;  %s129_s27 = sshll.u32 (%p82_p0), %s364_s5, 4  ;;  %s128_s24 = int_to_ptr.vmem [resolvable:$true] %s127_s24  ;;  %s130_s27 = int_to_ptr.hbm [resolvable:$true] %s129_s27 }
  0x26   : > { %v99_v7 = vmul.f32 %v98_v6, %v77_v1  ;;  %v105_v8 = vstv %s104_s19 }
  0x27   : > { %v106_v9 = vmul.f32 %v105_v8, %v79_v2  ;;  %v109_v11 = vstv %s108_s20 }
  0x28   : > { %v100_v10 = vadd.f32 %v99_v7, %v89_v5  ;;  %v113_v14 = vstv %s111_s21 }
  0x2a   : > { %v107_v12 = vadd.f32 %v106_v9, %v100_v10  ;;  %v117_v18 = vstv (%p82_p0), %s116_s22 }
  0x2c   : > { %v110_v13 = vadd.f32 %v109_v11, %v107_v12 }
  0x2e   : > { %v112_v15 = vmax.f32 %v110_v13, 0.0 }
  0x30   : > { %v114_v16 = vmul.f32 %v113_v14, %v112_v15  ;;  %84 = sbr.rel (!%p82_p0) target bundleno = 27 (0x1b), region = 65 }
  0x32   : > { %v115_v17 = vadd.f32 %v285_v3, %v114_v16  }
  0x34   : > { %v284_v3 = vmov %v115_v17   ;;  %v118_v19 = vadd.f32 (%p82_p0), %v117_v18, %v115_v17 }
  0x36   :  { %179 = vtanh.f32 %v118_v19 }
  0x3c   :  { %v180_v20 = vpop.eup %179 }
  0x3d   :  { %v120_v21 = vmul.f32 2.0, %v180_v20 }
  0x3f   :  { %121 = vst [vmem:[#allocation12] sm:$0x1] %v120_v21 }
  0x40   :  { %132 = dma.vmem_to_hbm [thread:$0]  %s128_s24, 16, %s130_s27, [#allocation5]  }
  0x41   :  { %281 = dma.done.wait [#allocation5], 16  }
  0x42   :  { %282 = vsyncadd [#allocation5], 4294967280 }
  0x43   :  { %137 = vsyncpa [#allocation4], 1 }
  0x44   :  { %138 = vsyncpa [#allocation5], 1 }
  0x45   :  { %139 = vsyncpa [#allocation6], 1 }
  0x46   :  { %140 = vsyncpa [#allocation7], 1 }
  0x47   :  { %141 = vsyncpa [#allocation11], 1 }

</bundles_post_ra>
